<compile_context>
chip_gen: v6e
topology: v6e:2x2x1
jax: 0.10.0
libtpu: 0.0.40
codegen_flags: <defaults>
</compile_context>

<pallas_src>
import functools

import jax
import jax.numpy as jnp
from jax.experimental import pallas as pl
from jax.experimental.pallas import tpu as pltpu


def _floor8(v: int) -> int:
    return max(8, (int(v) // 8) * 8)


def _focal_loss_kernel(logits_ref, target_ref, out_ref, *,
                       gamma: float, n_valid: int, tile_rows: int):
    """Full-C path: one (TN, C) logits block per grid step."""
    i = pl.program_id(0)

    x_raw = logits_ref[...]                                 # (TN, C) input dtype
    tn, c = x_raw.shape
    t = target_ref[...]                                     # (TN, 1) int32

    # One-hot gather of the target logit in the raw input dtype; only the
    # (TN, 1) result is promoted to f32.
    col = jax.lax.broadcasted_iota(jnp.int32, (tn, c), 1)
    x_t = jnp.sum(jnp.where(col == t, x_raw, jnp.zeros_like(x_raw)),
                  axis=-1, keepdims=True, dtype=jnp.float32)

    # Numerically stable log-sum-exp in f32.
    x = x_raw.astype(jnp.float32)
    m = jnp.max(x, axis=-1, keepdims=True)
    lse = jnp.log(jnp.sum(jnp.exp(x - m), axis=-1, keepdims=True)) + m

    log_pt = jnp.minimum(x_t - lse, 0.0)                    # (TN, 1), <= 0
    if gamma == 0.0:
        per_row = -log_pt
    else:
        pt = jnp.exp(log_pt)
        focal_w = jnp.exp(jnp.float32(gamma) * jnp.log1p(-pt))
        per_row = -focal_w * log_pt

    # Mask rows past the true batch size (ragged last row tile reads garbage).
    row = jax.lax.broadcasted_iota(jnp.int32, (tn, 1), 0) + i * tile_rows
    per_row = jnp.where(row < n_valid, per_row, jnp.zeros_like(per_row))

    out_ref[0, 0] = jnp.sum(per_row)                        # per-tile partial sum


def _focal_loss_kernel_ctiled(logits_ref, target_ref, out_ref,
                              m_sc, l_sc, xt_sc, *,
                              gamma: float, n_valid: int, n_classes: int,
                              tile_rows: int, tile_cols: int):
    """Large-C path: online log-sum-exp over (row tile, C tile) grid."""
    i = pl.program_id(0)
    j = pl.program_id(1)
    num_c_tiles = pl.num_programs(1)

    @pl.when(j == 0)
    def _():
        m_sc[...] = jnp.full_like(m_sc, -jnp.inf)
        l_sc[...] = jnp.zeros_like(l_sc)
        xt_sc[...] = jnp.zeros_like(xt_sc)

    x_raw = logits_ref[...]                                 # (TN, TC) input dtype
    tn, tc = x_raw.shape
    t = target_ref[...]                                     # (TN, 1) int32

    # Global column ids of this C tile; mask the ragged last C tile.
    col = jax.lax.broadcasted_iota(jnp.int32, (tn, tc), 1) + j * tile_cols
    valid = col < n_classes

    # One-hot gather in the raw dtype (at most one hit across all C tiles).
    xt_new = xt_sc[...] + jnp.sum(
        jnp.where(col == t, x_raw, jnp.zeros_like(x_raw)),
        axis=-1, keepdims=True, dtype=jnp.float32)

    # Online log-sum-exp update in f32.
    x = jnp.where(valid, x_raw.astype(jnp.float32), -jnp.inf)
    m_old = m_sc[...]
    m_new = jnp.maximum(m_old, jnp.max(x, axis=-1, keepdims=True))
    l_new = (l_sc[...] * jnp.exp(m_old - m_new)
             + jnp.sum(jnp.exp(x - m_new), axis=-1, keepdims=True))

    m_sc[...] = m_new
    l_sc[...] = l_new
    xt_sc[...] = xt_new

    @pl.when(j == num_c_tiles - 1)
    def _():
        lse = jnp.log(l_new) + m_new
        log_pt = jnp.minimum(xt_new - lse, 0.0)              # (TN, 1), <= 0
        if gamma == 0.0:
            per_row = -log_pt
        else:
            pt = jnp.exp(log_pt)
            focal_w = jnp.exp(jnp.float32(gamma) * jnp.log1p(-pt))
            per_row = -focal_w * log_pt
        row = (jax.lax.broadcasted_iota(jnp.int32, per_row.shape, 0)
               + i * tile_rows)
        per_row = jnp.where(row < n_valid, per_row, jnp.zeros_like(per_row))
        out_ref[0, 0] = jnp.sum(per_row)


def focal_loss_criterion(logits, target, gamma: float = 0.7,
                         tile_rows=None, tile_cols=None):
    """logits: [N, C] float, target: [N] integer class ids -> scalar f32 loss."""
    n, c = logits.shape
    target2d = target.astype(jnp.int32).reshape(n, 1)
    itemsize = jnp.dtype(logits.dtype).itemsize
    c_pad = 128 * pl.cdiv(c, 128)
    n_pad8 = 8 * pl.cdiv(n, 8)

    # VMEM working-set budget sized for the smallest-VMEM chip (v7x: 64 MiB
    # physical per TC, 32 MiB scoped).  Includes input double-buffers, ~4
    # full-tile f32 temporaries and the lane-padded target block.
    budget = 24 * 1024 * 1024
    vmem_limit = 32 * 1024 * 1024

    # Keep >= ~8 row tiles when auto-sizing so v7x's 2 TensorCores stay busy.
    parallel_cap = _floor8(pl.cdiv(n, 8))

    use_c_tiling = (tile_cols is not None) or (c_pad > 4096)

    if not use_c_tiling:
        # Per-row bytes: 2x double-buffered input row + ~4 full-width f32
        # temporaries + lane-padded (TN,1) int32 target row (512 B / buffer).
        bytes_per_row = 2 * c * itemsize + 4 * c_pad * 4 + 2 * 512
        if tile_rows is None:
            tn = _floor8(budget // bytes_per_row)
            tn = min(tn, 8192, parallel_cap)
        else:
            tn = _floor8(tile_rows)
        tn = min(tn, n_pad8)
        num_tiles = pl.cdiv(n, tn)

        kernel = functools.partial(
            _focal_loss_kernel, gamma=float(gamma), n_valid=n, tile_rows=tn)

        partial_sums = pl.pallas_call(
            kernel,
            out_shape=jax.ShapeDtypeStruct((num_tiles, 1), jnp.float32),
            grid_spec=pltpu.PrefetchScalarGridSpec(
                num_scalar_prefetch=0,
                grid=(num_tiles,),
                in_specs=[
                    pl.BlockSpec((tn, c), lambda i: (i, 0)),
                    pl.BlockSpec((tn, 1), lambda i: (i, 0)),
                ],
                out_specs=pl.BlockSpec((1, 1), lambda i: (i, 0),
                                       memory_space=pltpu.MemorySpace.SMEM),
            ),
            compiler_params=pltpu.CompilerParams(
                dimension_semantics=("parallel",),
                vmem_limit_bytes=vmem_limit,
            ),
        )(logits, target2d)
    else:
        tc = int(tile_cols) if tile_cols is not None else 2048
        tc = min(128 * pl.cdiv(tc, 128), c_pad)              # multiple of 128
        num_c_tiles = pl.cdiv(c, tc)
        # Extra 3*512 B/row: the three (TN,1) f32 online-LSE scratch buffers.
        bytes_per_row = 2 * tc * itemsize + 4 * tc * 4 + 2 * 512 + 3 * 512
        if tile_rows is None:
            tn = _floor8(budget // bytes_per_row)
            tn = min(tn, 8192, parallel_cap)
        else:
            tn = _floor8(tile_rows)
        tn = min(tn, n_pad8)
        num_row_tiles = pl.cdiv(n, tn)

        kernel = functools.partial(
            _focal_loss_kernel_ctiled, gamma=float(gamma), n_valid=n,
            n_classes=c, tile_rows=tn, tile_cols=tc)

        partial_sums = pl.pallas_call(
            kernel,
            out_shape=jax.ShapeDtypeStruct((num_row_tiles, 1), jnp.float32),
            grid_spec=pltpu.PrefetchScalarGridSpec(
                num_scalar_prefetch=0,
                grid=(num_row_tiles, num_c_tiles),
                in_specs=[
                    pl.BlockSpec((tn, tc), lambda i, j: (i, j)),
                    pl.BlockSpec((tn, 1), lambda i, j: (i, 0)),
                ],
                out_specs=pl.BlockSpec((1, 1), lambda i, j: (i, 0),
                                       memory_space=pltpu.MemorySpace.SMEM),
                scratch_shapes=[pltpu.VMEM((tn, 1), jnp.float32),
                                pltpu.VMEM((tn, 1), jnp.float32),
                                pltpu.VMEM((tn, 1), jnp.float32)],
            ),
            compiler_params=pltpu.CompilerParams(
                dimension_semantics=("parallel", "arbitrary"),
                vmem_limit_bytes=vmem_limit,
            ),
        )(logits, target2d)

    return jnp.sum(partial_sums) / jnp.float32(n)


def _reference(logits, target, gamma=0.7):
    p = jax.nn.softmax(logits.astype(jnp.float32), axis=-1)
    pt = jnp.take_along_axis(p, target[:, None], axis=-1)[:, 0]
    return jnp.mean(-((1.0 - pt) ** gamma) * jnp.log(pt))


if __name__ == "__main__":
    key = jax.random.PRNGKey(0)
    k1, k2, k3, k4, k5, k6 = jax.random.split(key, 6)

    # 1) Small case matching the module's forward (softmax over last dim).
    N, C = 8, 32
    logits = jax.random.normal(k1, (N, C), dtype=jnp.float32)
    target = jax.random.randint(k2, (N,), 0, C, dtype=jnp.int32)
    loss = jax.block_until_ready(focal_loss_criterion(logits, target, gamma=0.7))
    ref = _reference(logits, target, gamma=0.7)
    assert jnp.allclose(loss, ref, atol=1e-5, rtol=1e-5), (loss, ref)

    # 2) Multi-row-tile + ragged last row tile (full-C path).
    N2, C2 = 300, 128
    logits2 = jax.random.normal(k3, (N2, C2), dtype=jnp.float32)
    target2 = jax.random.randint(k4, (N2,), 0, C2, dtype=jnp.int32)
    loss2 = jax.block_until_ready(
        focal_loss_criterion(logits2, target2, gamma=0.7, tile_rows=128))
    ref2 = _reference(logits2, target2, gamma=0.7)
    assert jnp.allclose(loss2, ref2, atol=1e-5, rtol=1e-5), (loss2, ref2)

    # 3) C-tiled (large-vocab) path exercised at small shapes: C not a multiple
    #    of 128, N not a multiple of the row tile, bf16 logits (raw-dtype gather).
    N3, C3 = 100, 200
    logits3 = jax.random.normal(k5, (N3, C3), dtype=jnp.float32).astype(jnp.bfloat16)
    target3 = jax.random.randint(k6, (N3,), 0, C3, dtype=jnp.int32)
    loss3 = jax.block_until_ready(
        focal_loss_criterion(logits3, target3, gamma=0.7, tile_cols=128))
    ref3 = _reference(logits3.astype(jnp.float32), target3, gamma=0.7)
    assert jnp.allclose(loss3, ref3, atol=2e-4, rtol=2e-4), (loss3, ref3)

    print("KERNEL_OK")
</pallas_src>

<mosaic_0001>
module attributes {stable_mosaic.version = 11 : i64} {
  func.func @_focal_loss_kernel(%arg0: i32, %arg1: memref<8x32xf32, #tpu.memory_space<vmem>>, %arg2: memref<8x1xi32, #tpu.memory_space<vmem>>, %arg3: memref<1x1xf32, #tpu.memory_space<smem>>) attributes {dimension_semantics = [#tpu.dimension_semantics<parallel>], iteration_bounds = array<i64: 1>, scalar_prefetch = 0 : i64, scratch_operands = 0 : i64, tpu.core_type = #tpu.core_type<tc>, window_params = [{transform_indices = @transform_0, window_bounds = array<i64: 8, 32>}, {transform_indices = @transform_1, window_bounds = array<i64: 8, 1>}, {transform_indices = @transform_2, window_bounds = array<i64: 1, 1>}]} {
    %c0 = arith.constant 0 : index
    %c0_0 = arith.constant 0 : index
    %0 = vector.load %arg1[%c0, %c0_0] : memref<8x32xf32, #tpu.memory_space<vmem>>, vector<8x32xf32>
    %c0_1 = arith.constant 0 : index
    %c0_2 = arith.constant 0 : index
    %1 = vector.load %arg2[%c0_1, %c0_2] : memref<8x1xi32, #tpu.memory_space<vmem>>, vector<8x1xi32>
    %2 = tpu.iota {dimensions = array<i32: 1>} : vector<8x32xi32>
    %3 = vector.broadcast %1 : vector<8x1xi32> to vector<8x32xi32>
    %4 = arith.cmpi eq, %2, %3 : vector<8x32xi32>
    %cst = arith.constant 0.000000e+00 : f32
    %5 = vector.broadcast %cst : f32 to vector<8x32xf32>
    %6 = arith.select %4, %0, %5 : vector<8x32xi1>, vector<8x32xf32>
    %cst_3 = arith.constant dense<0.000000e+00> : vector<8xf32>
    %7 = vector.multi_reduction <add>, %6, %cst_3 [1] : vector<8x32xf32> to vector<8xf32>
    %8 = vector.shape_cast %7 : vector<8xf32> to vector<8x1xf32>
    %cst_4 = arith.constant dense<0xFF800000> : vector<8xf32>
    %9 = vector.multi_reduction <maximumf>, %0, %cst_4 [1] : vector<8x32xf32> to vector<8xf32>
    %10 = vector.shape_cast %9 : vector<8xf32> to vector<8x1xf32>
    %11 = vector.broadcast %10 : vector<8x1xf32> to vector<8x32xf32>
    %12 = arith.subf %0, %11 : vector<8x32xf32>
    %13 = math.exp %12 : vector<8x32xf32>
    %cst_5 = arith.constant dense<0.000000e+00> : vector<8xf32>
    %14 = vector.multi_reduction <add>, %13, %cst_5 [1] : vector<8x32xf32> to vector<8xf32>
    %15 = vector.shape_cast %14 : vector<8xf32> to vector<8x1xf32>
    %16 = math.log %15 : vector<8x1xf32>
    %17 = arith.addf %16, %10 : vector<8x1xf32>
    %18 = arith.subf %8, %17 : vector<8x1xf32>
    %cst_6 = arith.constant 0.000000e+00 : f32
    %19 = vector.broadcast %cst_6 : f32 to vector<8x1xf32>
    %20 = arith.minimumf %18, %19 : vector<8x1xf32>
    %21 = math.exp %20 : vector<8x1xf32>
    %cst_7 = arith.constant 0.000000e+00 : f32
    %22 = vector.broadcast %cst_7 : f32 to vector<8x1xf32>
    %23 = arith.subf %22, %21 : vector<8x1xf32>
    %24 = math.log1p %23 : vector<8x1xf32>
    %cst_8 = arith.constant 0.699999988 : f32
    %25 = vector.broadcast %cst_8 : f32 to vector<8x1xf32>
    %26 = arith.mulf %25, %24 : vector<8x1xf32>
    %27 = math.exp %26 : vector<8x1xf32>
    %cst_9 = arith.constant 0.000000e+00 : f32
    %28 = vector.broadcast %cst_9 : f32 to vector<8x1xf32>
    %29 = arith.subf %28, %27 : vector<8x1xf32>
    %30 = arith.mulf %29, %20 : vector<8x1xf32>
    %31 = tpu.iota {dimensions = array<i32: 0>} : vector<8x1xi32>
    %c8_i32 = arith.constant 8 : i32
    %32 = arith.muli %arg0, %c8_i32 : i32
    %33 = vector.broadcast %32 : i32 to vector<8x1xi32>
    %34 = arith.addi %31, %33 : vector<8x1xi32>
    %c8_i32_10 = arith.constant 8 : i32
    %35 = vector.broadcast %c8_i32_10 : i32 to vector<8x1xi32>
    %36 = arith.cmpi slt, %34, %35 : vector<8x1xi32>
    %cst_11 = arith.constant 0.000000e+00 : f32
    %37 = vector.broadcast %cst_11 : f32 to vector<8x1xf32>
    %38 = arith.select %36, %30, %37 : vector<8x1xi1>, vector<8x1xf32>
    %39 = vector.shape_cast %38 : vector<8x1xf32> to vector<1x8x1xf32>
    %cst_12 = arith.constant dense<0.000000e+00> : vector<1xf32>
    %40 = vector.multi_reduction <add>, %39, %cst_12 [1, 2] : vector<1x8x1xf32> to vector<1xf32>
    %41 = vector.shape_cast %40 : vector<1xf32> to vector<1x1x1xf32>
    %42 = vector.extract %41[0, 0, 0] : f32 from vector<1x1x1xf32>
    %c0_13 = arith.constant 0 : index
    %c0_14 = arith.constant 0 : index
    %43 = memref.load %arg3[%c0_13, %c0_14] : memref<1x1xf32, #tpu.memory_space<smem>>
    memref.store %42, %arg3[%c0_13, %c0_14] : memref<1x1xf32, #tpu.memory_space<smem>>
    return
  }
  func.func @transform_0(%arg0: i32) -> (i32, i32) {
    %c0_i32 = arith.constant 0 : i32
    %c0_i32_0 = arith.constant 0 : i32
    return %arg0, %c0_i32 : i32, i32
  }
  func.func @transform_1(%arg0: i32) -> (i32, i32) {
    %c0_i32 = arith.constant 0 : i32
    %c0_i32_0 = arith.constant 0 : i32
    return %arg0, %c0_i32 : i32, i32
  }
  func.func @transform_2(%arg0: i32) -> (i32, i32) {
    %c0_i32 = arith.constant 0 : i32
    %c0_i32_0 = arith.constant 0 : i32
    return %arg0, %c0_i32 : i32, i32
  }
}

</mosaic_0001>

<bundles_post_ra>
// kernel: tpu_custom_call.1
= control target key start
LH: loop header
LB: loop body
LE: loop exit
PB: predicated region body
PF: predicated region fallthrough
CT: control target
= control target key end

     0   :  { %vm21_vm0 = vcmask 261120   ;;  %s143_s0 = inlined_call_operand.vmem [shape: f32[8,32], index: 0, kind: input, shape index: {}]   ;;  %s144_s1 = inlined_call_operand.vmem [shape: s32[8,1], index: 1, kind: input, shape index: {}]   ;;  %s145_s2 = inlined_call_operand.hbm [shape: f32[1,1], index: 2, kind: output, shape index: {}]  }
   0x1   :  { %v12_v0 = vld [vmem:[%s143_s0] sm:$0xff] }
   0x2   :  { %7 = vsyncpa [#allocation3], 0  ;;  %v25_v1 = vsel %vm21_vm0, %v12_v0, -inf  ;;  %v114_v2 = vmov 0   ;;  %v13_v3 = vld [vmem:[%s144_s1] sm:$0xff]  ;;  %v14_v7 = vlaneseq  ;;  %vm63_vm3 = vcmask 7168  }
   0x3   :  { %93 = vset.pattern.permute.xlu0 %v114_v2  ;;  %s115_s1 = smov [#allocation2]  }
   0x4   :  { %26 = vmax.xlane.f32.xlu0 %v25_v1  ;;  %v15_v8 = vand.u32 127, %v14_v7 }
  0x1a   :  { %17 = vperm.xlu0 %93, %v13_v3  }
  0x8d   :  { %v27_v4 = vpop.xlane.xlu0 %26 }
  0x8e   :  { %v28_v5 = vsub.f32 %v12_v0, %v27_v4 }
  0x90   :  { %v29_v6 = vmul.f32 1.442695, %v28_v5 }
  0x92   :  { %94 = vpow2.f32 %v29_v6 }
  0x95   :  { %v18_v9 = vpop.permute.xlu0 %17 }
  0x96   :  { %vm19_vm1 = vcmp.eq.s32.totalorder %v15_v8, %v18_v9 }
  0x97   :  { %v20_v11 = vsel %vm19_vm1, %v12_v0, 0.0 }
  0x98   :  { %v22_v13 = vsel %vm21_vm0, %v20_v11, 0.0 }
  0x9f   :  { %v95_v10 = vpop.eup %94 }
  0xa0   :  { %v31_v12 = vsel %vm21_vm0, %v95_v10, 0.0 }
  0xa1   :  { %32 = vadd.xlane.f32.xlu1 %v31_v12 }
  0xa5   :  { %23 = vadd.xlane.f32.xlu1 %v22_v13 }
 0x12a   :  { %v33_v14 = vpop.xlane.xlu1 %32 }
 0x12b   :  { %96 = vlog2.f32 %v33_v14 }
 0x12e   :  { %v24_v17 = vpop.xlane.xlu1 %23 }
 0x138   :  { %v97_v15 = vpop.eup %96 }
 0x139   :  { %v35_v16 = vmul.f32 0.6931472, %v97_v15 }
 0x13b   :  { %v36_v18 = vadd.f32 %v35_v16, %v27_v4 }
 0x13d   :  { %v37_v19 = vsub.f32 %v24_v17, %v36_v18 }
 0x13f   :  { %v38_v20 = vmin.f32 %v37_v19, 0.0 }
 0x141   :  { %v39_v21 = vmul.f32 1.442695, %v38_v20 }
 0x143   :  { %98 = vpow2.f32 %v39_v21 }
 0x150   :  { %v99_v22 = vpop.eup %98 }
 0x151   :  { %v41_v23 = vsub.f32 0.0, %v99_v22 }
 0x153   :  { %v42_v24 = vadd.f32 1.0, %v41_v23  ;;  %v45_v25 = vmul.f32 -0.5, %v41_v23  ;;  %v48_v27 = vand.u32 2147483647, %v41_v23 }
 0x155   :  { %100 = vlog2.f32 %v42_v24  ;;  %v46_v26 = vadd.f32 1.0, %v45_v25  ;;  %vm49_vm2 = vcmp.lt.f32.partialorder %v48_v27, 0.0004427343 }
 0x157   :  { %v47_v30 = vmul.f32 %v46_v26, %v41_v23 }
 0x162   :  { %v101_v28 = vpop.eup %100 }
 0x163   :  { %v44_v29 = vmul.f32 0.6931472, %v101_v28 }
 0x165   :  { %v50_v31 = vsel %vm49_vm2, %v47_v30, %v44_v29 }
 0x166   :  { %v51_v32 = vmul.f32 0.7, %v50_v31 }
 0x168   :  { %v52_v33 = vmul.f32 1.442695, %v51_v32 }
 0x16a   :  { %102 = vpow2.f32 %v52_v33 }
 0x177   :  { %v103_v34 = vpop.eup %102 }
 0x178   :  { %v54_v35 = vsub.f32 0.0, %v103_v34 }
 0x17a   :  { %v55_v36 = vmul.f32 %v54_v35, %v38_v20 }
 0x17c   :  { %v64_v37 = vsel %vm63_vm3, %v55_v36, 0.0 }
 0x17d   :  { %65 = vadd.xlane.f32.xlu1 %v64_v37 }
 0x206   :  { %v66_v38 = vpop.xlane.xlu1 %65 }
 0x207   :  { %v67_v39 = vrot.slane %v66_v38, 4 }
 0x209   :  { %v68_v40 = vadd.f32 %v67_v39, %v66_v38 }
 0x20b   :  { %v69_v41 = vrot.slane %v68_v40, 2 }
 0x20d   :  { %v70_v42 = vadd.f32 %v69_v41, %v68_v40 }
 0x20f   :  { %v71_v43 = vrot.slane %v70_v42, 1 }
 0x211   :  { %v72_v44 = vadd.f32 %v71_v43, %v70_v42 }
 0x213   :  { %89 = vpush %v72_v44 }
 0x244   :  { %s90_s0 = spop %89 }
 0x245   :  { %75 = sst [smem:[#allocation2]] %s90_s0 }
 0x246   :  { %83 = dma.smem_to_hbm %s115_s1, 16, %s145_s2, [#allocation3]  }
 0x247   :  { %112 = dma.done.wait [#allocation3], 16  }
 0x248   :  { %113 = vsyncadd [#allocation3], 4294967280 }
 0x249   :  { %87 = sfence }
 0x24a   :  { %88 = vsyncpa [#allocation3], 1 }

</bundles_post_ra>
